<compile_context>
chip_gen: v7x
topology: tpu7x:2x2x1
jax: 0.10.0
libtpu: 0.0.40
codegen_flags: <defaults>
</compile_context>

<pallas_src>
import jax
import jax.numpy as jnp
from jax.experimental import pallas as pl
from jax.experimental.pallas import tpu as pltpu

# ----- model hyperparameters from the original script --------------------------
sentences = ['i like cat', 'i love coffee', 'i hate milk']
sentences_list = ' '.join(sentences).split()
V = sorted(set(sentences_list))     # sorted for determinism
V_count = len(V)                    # 7
h_n = 1
m = 2
n = 3
n_ctx = n - 1                       # 2 context words per sample
mn = m * n_ctx                      # 4
B = len(sentences)                  # 3 training samples

# ----- TPU-friendly padded layout ----------------------------------------------
B_PAD = 8          # sublane-aligned batch (rows B..7 are zero, sliced off outside)
LANES = 128        # lane-dense output / weight width
COL_H = V_count    # slab column holding H (pre-tanh hidden sits in this column)


def nnlm_kernel(x_ref, slab_ref, out_ref):
    """Fused NNLM step: logits = x@W + tanh(x@H) * U on (8,128)-padded tiles.

    x_ref:    (B_PAD, mn)    f32  gathered context embeddings (zero-padded rows)
    slab_ref: (8, LANES)     f32  rows 0..mn-1 = [W | H | 0...], row mn = [U | 0...]
    out_ref:  (B_PAD, LANES) f32  cols 0..V-1 = logits; col V = pre-tanh junk; rest 0
    """
    x = x_ref[...]                       # (B_PAD, mn)
    slab = slab_ref[...]                 # (8, LANES) — single full-tile load
    hw = slab[:mn, :]                    # (mn, LANES) = [W | H | zeros]
    u = slab[mn:mn + 1, :]               # (1, LANES)  = [U | zeros]

    # Single MXU push: cols 0..V-1 = x @ W, col V = x @ H, rest 0.
    xhw = jnp.dot(x, hw, preferred_element_type=jnp.float32)   # (B_PAD, LANES)

    # tanh only on the narrow (B_PAD, 1) hidden column — not the padded slab.
    h = jnp.tanh(xhw[:, COL_H:COL_H + 1])                      # (B_PAD, 1)

    # h_n == 1  =>  h @ U is an outer product: VPU broadcast mul-add, no 3rd matmul.
    # (Column COL_H gets x@H + h*0 = junk; padded lanes/rows stay exactly 0.)
    out_ref[...] = xhw + h * u


@jax.jit
def nnlm_forward(onehot, C, H, W, U):
    """Exact forward of the PyTorch NNLM. `onehot`: (B, n-1, V_count) one-hot f32."""
    Bn = onehot.shape[0]

    # Embedding lookup: (onehot @ C).view(-1, mn) == exact row gather of C for
    # one-hot input.  Done in the jitted wrapper (reviewer-sanctioned) so the
    # kernel carries no full-tile-padded one-hot matmul.
    idx = jnp.argmax(onehot, axis=-1).reshape(-1)               # (B * n_ctx,)
    x = jnp.take(C, idx, axis=0).reshape(Bn, mn)                # (B, mn)
    x_pad = jnp.zeros((B_PAD, mn), jnp.float32).at[:Bn].set(x)  # zero-padded rows

    # Pack ALL weights into one lane-dense (8, 128) slab -> a single input DMA:
    #   rows 0..mn-1, cols 0..V-1 -> W ; rows 0..mn-1, col V -> H ; row mn -> U
    slab = jnp.zeros((8, LANES), jnp.float32)
    slab = slab.at[:mn, :V_count].set(W)
    slab = slab.at[:mn, COL_H].set(H[:, 0])
    slab = slab.at[mn, :V_count].set(U[0, :])

    out_pad = pl.pallas_call(
        nnlm_kernel,
        out_shape=jax.ShapeDtypeStruct((B_PAD, LANES), jnp.float32),
        in_specs=[
            pl.BlockSpec(memory_space=pltpu.MemorySpace.VMEM),
            pl.BlockSpec(memory_space=pltpu.MemorySpace.VMEM),
        ],
        out_specs=pl.BlockSpec(memory_space=pltpu.MemorySpace.VMEM),
    )(x_pad, slab)

    return out_pad[:Bn, :V_count]


if __name__ == "__main__":
    key = jax.random.PRNGKey(0)
    k_idx, kC, kH, kW, kU = jax.random.split(key, 5)

    # Deterministic "sentence" inputs: one-hot of 2 context-word ids per sample.
    idx = jax.random.randint(k_idx, (B, n_ctx), 0, V_count)
    onehot = jax.nn.one_hot(idx, V_count, dtype=jnp.float32)        # (3, 2, 7)

    # Parameters (torch.randn -> standard normal), deterministic.
    C = jax.random.normal(kC, (V_count, m), dtype=jnp.float32)      # (7, 2)
    H = jax.random.normal(kH, (mn, h_n), dtype=jnp.float32)         # (4, 1)
    W = jax.random.normal(kW, (mn, V_count), dtype=jnp.float32)     # (4, 7)
    U = jax.random.normal(kU, (h_n, V_count), dtype=jnp.float32)    # (1, 7)

    out = jax.block_until_ready(nnlm_forward(onehot, C, H, W, U))

    # Plain-JAX reference of the exact PyTorch forward semantics.
    ref_x = (onehot @ C).reshape(B, mn)
    ref = ref_x @ W + jnp.tanh(ref_x @ H) @ U
    assert out.shape == (B, V_count)
    assert jnp.allclose(out, ref, rtol=1e-3, atol=1e-3)

    print("KERNEL_OK")
</pallas_src>

<mosaic_0001>
module attributes {stable_mosaic.version = 11 : i64} {
  func.func @nnlm_kernel(%arg0: memref<8x4xf32, #tpu.memory_space<vmem>>, %arg1: memref<8x128xf32, #tpu.memory_space<vmem>>, %arg2: memref<8x128xf32, #tpu.memory_space<vmem>>) attributes {dimension_semantics = [], scalar_prefetch = 0 : i64, scratch_operands = 0 : i64, tpu.core_type = #tpu.core_type<tc>} {
    %c0 = arith.constant 0 : index
    %c0_0 = arith.constant 0 : index
    %0 = vector.load %arg0[%c0, %c0_0] : memref<8x4xf32, #tpu.memory_space<vmem>>, vector<8x4xf32>
    %c0_1 = arith.constant 0 : index
    %c0_2 = arith.constant 0 : index
    %1 = vector.load %arg1[%c0_1, %c0_2] : memref<8x128xf32, #tpu.memory_space<vmem>>, vector<8x128xf32>
    %2 = vector.extract_strided_slice %1 {offsets = [0, 0], sizes = [4, 128], strides = [1, 1]} : vector<8x128xf32> to vector<4x128xf32>
    %3 = vector.extract_strided_slice %1 {offsets = [4, 0], sizes = [1, 128], strides = [1, 1]} : vector<8x128xf32> to vector<1x128xf32>
    %cst = arith.constant dense<0.000000e+00> : vector<8x128xf32>
    %4 = tpu.matmul %0, %2, %cst {dimension_numbers = #tpu.dot_dimension_numbers<[1], [0], [0], [1], [0, 0, 1, 1], [], []>} : vector<8x4xf32>, vector<4x128xf32>, vector<8x128xf32> -> vector<8x128xf32>
    %5 = vector.extract_strided_slice %4 {offsets = [0, 7], sizes = [8, 1], strides = [1, 1]} : vector<8x128xf32> to vector<8x1xf32>
    %6 = math.tanh %5 : vector<8x1xf32>
    %7 = vector.broadcast %6 : vector<8x1xf32> to vector<8x128xf32>
    %8 = vector.broadcast %3 : vector<1x128xf32> to vector<8x128xf32>
    %9 = arith.mulf %7, %8 : vector<8x128xf32>
    %10 = arith.addf %4, %9 : vector<8x128xf32>
    %c0_3 = arith.constant 0 : index
    %c0_4 = arith.constant 0 : index
    %11 = vector.load %arg2[%c0_3, %c0_4] : memref<8x128xf32, #tpu.memory_space<vmem>>, vector<8x128xf32>
    tpu.vector_store %arg2[%c0_3, %c0_4], %10 {strides = array<i32>} : memref<8x128xf32, #tpu.memory_space<vmem>>, vector<8x128xf32>,
    return
  }
}

</mosaic_0001>

<bundles_post_ra>
// kernel: nnlm_forward.1
= control target key start
LH: loop header
LB: loop body
LE: loop exit
PB: predicated region body
PF: predicated region fallthrough
CT: control target
= control target key end

     0   :  { %vm17_vm0 = vcmask 1043456   ;;  %vm13_vm1 = vcmask 31744   ;;  %v123_v0 = vmov 0.0   ;;  %vm124_vm2 = vmmov 0   ;;  %s150_s1 = inlined_call_operand.vmem [shape: f32[8,128], index: 1, kind: input, shape index: {}]   ;;  %s151_s0 = inlined_call_operand.vmem [shape: f32[8,4], index: 0, kind: input, shape index: {}]   ;;  %s152_s2 = inlined_call_operand.vmem [shape: f32[8,128], index: 2, kind: output, shape index: {}]  }
   0x1   :  { %112 = vmatprep.subr.mxu0 %v123_v0  ;;  %v12_v1 = vld [vmem:[%s150_s1] sm:$0xff]  ;;  %114 = vmatprep.mubr.msk.f32.mxu0 %vm124_vm2, %v123_v0  ;;  %v125_v3 = vmov 7   ;;  %v97_v7 = vlaneseq }
   0x2   :  { %v11_v2 = vld [vmem:[%s151_s0] sm:$0xff]  ;;  %113 = vmatpush3.msk.msra.mxu0 %vm17_vm0, %v12_v1  ;;  %120 = vset.pattern.permute.xlu0 %v125_v3 }
   0x3   :  { %115 = vmatmul.mubr.msk.f32.vlgmr.msra.gmra.mrb[0].mxu0 %vm13_vm1, %v11_v2  ;;  %v98_v8 = vshrl.u32 %v97_v7, 7 }
   0x5   :  { %v99_v9 = vsub.s32 4, %v98_v8 }
   0x7   :  { %v100_v10 = vrot.slane %v12_v1, %v99_v9 }
  0xd6   :  { %v87_v4 = vpop.f32.mrb[0].mxu0 }
  0xd7   :  { %121 = vtanh.f32 %v87_v4  ;;  %v116_v5 = vpop.f32.mrb[1].mxu0 }
  0xe1   :  { %v122_v6 = vpop.eup %121 }
  0xe2   :  { %94 = vperm.xlu0 %120, %v122_v6  }
 0x161   :  { %v95_v11 = vpop.permute.xlu0 %94 }
 0x162   :  { %v101_v12 = vmul.f32 %v100_v10, %v95_v11 }
 0x164   :  { %v102_v13 = vadd.f32 %v101_v12, %v87_v4 }
 0x166   :  { %103 = vst [vmem:[%s152_s2] sm:$0xff] %v102_v13 }

</bundles_post_ra>
